<compile_context>
chip_gen: v7x
topology: tpu7x:2x2x1
jax: 0.10.0
libtpu: 0.0.40
codegen_flags: <defaults>
</compile_context>

<pallas_src>
import functools

import jax
import jax.numpy as jnp
from jax.experimental import pallas as pl
from jax.experimental.pallas import tpu as pltpu


def _round_up(x, m):
    return ((x + m - 1) // m) * m


def _choose_tiles(h, w):
    """Spatial lane tile TM and halo block size (both multiples of 128, halo
    divides TM).  TM ~512 lanes amortizes per-step pipeline overhead while the
    per-step working set (2*(Cin*(TM+halo) + Cout*TM)*4B) stays far below even
    v7x's 64 MiB VMEM."""
    wp = w + 2
    s = h * wp
    halo_pad = _round_up(2 * wp + 2, 128)          # 3x3 halo, rounded to lanes
    tm = min(_round_up(512, halo_pad), _round_up(s, halo_pad))
    return max(tm, halo_pad), halo_pad


def _head_conv_kernel(xa_ref, xb_ref, w_ref, b_ref, o_ref, *, wp):
    """One (batch, spatial-tile) step of the fused 3x3 / pad=1 conv.

    xa_ref: (Cin, TM)        main input tile (flattened padded spatial on lanes)
    xb_ref: (Cin, HALO_PAD)  right halo (prefix of the next TM block)
    w_ref : (9, Cout, Cin)   per-tap weights, tap t = dh*3 + dw
    b_ref : (Cout, 1)        bias
    o_ref : (Cout, TM)       output tile (spatial on lanes -> lane-dense store)
    """
    tm = o_ref.shape[-1]
    x = jnp.concatenate([xa_ref[...], xb_ref[...]], axis=-1)   # (Cin, TM+HALO)
    acc = jnp.dot(w_ref[0], x[:, 0:tm], preferred_element_type=jnp.float32)
    for t in range(1, 9):                                      # unrolled, static
        off = (t // 3) * wp + (t % 3)
        acc = acc + jnp.dot(w_ref[t], x[:, off:off + tm],
                            preferred_element_type=jnp.float32)
    o_ref[...] = (acc + b_ref[...]).astype(o_ref.dtype)


@functools.partial(jax.jit, static_argnames=("h", "w", "tm", "halo_pad"))
def _head_forward(x_nchw, w_taps, bias2d, *, h, w, tm, halo_pad):
    n, cin = x_nchw.shape[0], x_nchw.shape[1]
    cout = w_taps.shape[1]
    wp = w + 2
    s = h * wp                        # number of computed (pre-slice) outputs
    s_pad = _round_up(s, tm)
    grid_j = s_pad // tm
    l_tot = s_pad + tm                # >= s_pad + halo_pad, multiple of halo_pad

    # Spatial zero-pad (pad=1), flatten spatial, prepend one zero so every tap
    # shift dh*(W+2)+dw is a non-negative lane offset, zero-pad the tail so all
    # (main + halo) blocks are in bounds.
    xp = jnp.pad(x_nchw, ((0, 0), (0, 0), (1, 1), (1, 1)))
    flat = xp.reshape(n, cin, (h + 2) * wp)
    flat = jnp.pad(flat, ((0, 0), (0, 0), (1, l_tot - 1 - (h + 2) * wp)))

    kernel = functools.partial(_head_conv_kernel, wp=wp)
    out_flat = pl.pallas_call(
        kernel,
        out_shape=jax.ShapeDtypeStruct((n, cout, s_pad), x_nchw.dtype),
        grid_spec=pltpu.PrefetchScalarGridSpec(
            num_scalar_prefetch=0,
            grid=(n, grid_j),
            in_specs=[
                # main tile: lanes [j*TM, (j+1)*TM)
                pl.BlockSpec((None, cin, tm), lambda b, j: (b, 0, j)),
                # right halo: lanes [(j+1)*TM, (j+1)*TM + HALO_PAD)
                pl.BlockSpec((None, cin, halo_pad),
                             lambda b, j: (b, 0, (j + 1) * (tm // halo_pad))),
                pl.BlockSpec((9, cout, cin), lambda b, j: (0, 0, 0)),
                pl.BlockSpec((cout, 1), lambda b, j: (0, 0)),
            ],
            out_specs=pl.BlockSpec((None, cout, tm), lambda b, j: (b, 0, j)),
        ),
        compiler_params=pltpu.CompilerParams(
            dimension_semantics=("parallel", "parallel"),
            vmem_limit_bytes=32 * 1024 * 1024),
    )(flat, flat, w_taps, bias2d)

    # Drop the padded spatial columns; result is already NCHW.
    return out_flat[:, :, :s].reshape(n, cout, h, wp)[:, :, :, 1:wp - 1]


class SdSegmentationHeadPallas:
    """JAX/Pallas port of SdSegmentationHead (kernel_size=3, upsampling=1,
    activation=None)."""

    def __init__(self, in_channels, out_channels, kernel_size=3, key=None):
        assert kernel_size == 3, "this port implements the default kernel_size=3"
        if key is None:
            key = jax.random.PRNGKey(0)
        self.in_channels = tuple(in_channels)
        self.out_channels = out_channels
        self.weights = []     # PyTorch layout (Cout, Cin, 3, 3) -- for reference
        self.biases = []
        self._w_taps = []     # (9, Cout, Cin), tap-major -- kernel layout
        self._biases2d = []   # (Cout, 1)
        for c in in_channels:
            key, kw_, kb_ = jax.random.split(key, 3)
            fan_in = c * kernel_size * kernel_size
            bound = 1.0 / float(fan_in) ** 0.5
            w = jax.random.uniform(kw_, (out_channels, c, 3, 3), jnp.float32,
                                   -bound, bound)
            b = jax.random.uniform(kb_, (out_channels,), jnp.float32,
                                   -bound, bound)
            self.weights.append(w)
            self.biases.append(b)
            self._w_taps.append(
                jnp.transpose(w, (2, 3, 0, 1)).reshape(9, out_channels, c))
            self._biases2d.append(b.reshape(out_channels, 1))

    def __call__(self, *features_nchw):
        # TODO(synk): heads whose features share (H, W) could be merged into one
        # pallas_call (concat along Cout) to amortize launch cost; kept per-head
        # because features may differ in both channels and spatial size.
        outs = []
        for x, wt, b2 in zip(features_nchw, self._w_taps, self._biases2d):
            _, _, h, wd = x.shape
            tm, halo_pad = _choose_tiles(h, wd)
            outs.append(_head_forward(x, wt, b2, h=h, w=wd,
                                      tm=tm, halo_pad=halo_pad))
        return outs


def _reference_conv_nchw(x, w, b):
    y = jax.lax.conv_general_dilated(
        x, w, window_strides=(1, 1), padding=((1, 1), (1, 1)),
        dimension_numbers=("NCHW", "OIHW", "NCHW"))
    return y + b.reshape(1, -1, 1, 1)


if __name__ == "__main__":
    key = jax.random.PRNGKey(0)
    k_x0, k_x1, k_params = jax.random.split(key, 3)

    in_channels = [4, 8]
    out_channels = 3
    batch, hgt, wid = 2, 16, 16

    # One feature map per head (mimics *features in the PyTorch forward).
    x0 = jax.random.normal(k_x0, (batch, in_channels[0], hgt, wid), jnp.float32)
    x1 = jax.random.normal(k_x1, (batch, in_channels[1], hgt, wid), jnp.float32)

    head = SdSegmentationHeadPallas(in_channels, out_channels, key=k_params)
    outs = head(x0, x1)
    outs = [jax.block_until_ready(o) for o in outs]

    # Numerical check against the XLA conv reference.
    for x, w, b, o in zip((x0, x1), head.weights, head.biases, outs):
        ref = _reference_conv_nchw(x, w, b)
        assert o.shape == (batch, out_channels, hgt, wid)
        err = float(jnp.max(jnp.abs(o - ref)))
        assert err < 1e-4, err

    print("KERNEL_OK")
</pallas_src>

<mosaic_0001>
module attributes {stable_mosaic.version = 11 : i64} {
  func.func @_head_conv_kernel(%arg0: i32, %arg1: i32, %arg2: memref<1x4x384xf32, #tpu.memory_space<vmem>>, %arg3: memref<1x4x128xf32, #tpu.memory_space<vmem>>, %arg4: memref<9x3x4xf32, #tpu.memory_space<vmem>>, %arg5: memref<3x1xf32, #tpu.memory_space<vmem>>, %arg6: memref<1x3x384xf32, #tpu.memory_space<vmem>>) attributes {dimension_semantics = [#tpu.dimension_semantics<parallel>, #tpu.dimension_semantics<parallel>], iteration_bounds = array<i64: 2, 1>, scalar_prefetch = 0 : i64, scratch_operands = 0 : i64, tpu.core_type = #tpu.core_type<tc>, window_params = [{transform_indices = @transform_0, window_bounds = array<i64: 1, 4, 384>}, {transform_indices = @transform_1, window_bounds = array<i64: 1, 4, 128>}, {pipeline_mode = #tpu.pipeline_mode<synchronous>, transform_indices = @transform_2, window_bounds = array<i64: 9, 3, 4>}, {pipeline_mode = #tpu.pipeline_mode<synchronous>, transform_indices = @transform_3, window_bounds = array<i64: 3, 1>}, {transform_indices = @transform_4, window_bounds = array<i64: 1, 3, 384>}]} {
    %c0 = arith.constant 0 : index
    %c0_0 = arith.constant 0 : index
    %c0_1 = arith.constant 0 : index
    %0 = vector.load %arg2[%c0, %c0_0, %c0_1] : memref<1x4x384xf32, #tpu.memory_space<vmem>>, vector<1x4x384xf32>
    %1 = vector.shape_cast %0 : vector<1x4x384xf32> to vector<4x384xf32>
    %c0_2 = arith.constant 0 : index
    %c0_3 = arith.constant 0 : index
    %c0_4 = arith.constant 0 : index
    %2 = vector.load %arg3[%c0_2, %c0_3, %c0_4] : memref<1x4x128xf32, #tpu.memory_space<vmem>>, vector<1x4x128xf32>
    %3 = vector.shape_cast %2 : vector<1x4x128xf32> to vector<4x128xf32>
    %4 = tpu.concatenate %1, %3 in 1 : vector<4x384xf32>, vector<4x128xf32> -> vector<4x512xf32>
    %c0_5 = arith.constant 0 : index
    %c0_6 = arith.constant 0 : index
    %c0_7 = arith.constant 0 : index
    %5 = vector.load %arg4[%c0_5, %c0_6, %c0_7] : memref<9x3x4xf32, #tpu.memory_space<vmem>>, vector<1x3x4xf32>
    %6 = vector.shape_cast %5 : vector<1x3x4xf32> to vector<3x4xf32>
    %7 = vector.extract_strided_slice %4 {offsets = [0, 0], sizes = [4, 384], strides = [1, 1]} : vector<4x512xf32> to vector<4x384xf32>
    %cst = arith.constant dense<0.000000e+00> : vector<3x384xf32>
    %8 = tpu.matmul %6, %7, %cst {dimension_numbers = #tpu.dot_dimension_numbers<[1], [0], [0], [1], [0, 0, 1, 1], [], []>} : vector<3x4xf32>, vector<4x384xf32>, vector<3x384xf32> -> vector<3x384xf32>
    %c1 = arith.constant 1 : index
    %c0_8 = arith.constant 0 : index
    %c0_9 = arith.constant 0 : index
    %9 = vector.load %arg4[%c1, %c0_8, %c0_9] : memref<9x3x4xf32, #tpu.memory_space<vmem>>, vector<1x3x4xf32>
    %10 = vector.shape_cast %9 : vector<1x3x4xf32> to vector<3x4xf32>
    %11 = vector.extract_strided_slice %4 {offsets = [0, 1], sizes = [4, 384], strides = [1, 1]} : vector<4x512xf32> to vector<4x384xf32>
    %cst_10 = arith.constant dense<0.000000e+00> : vector<3x384xf32>
    %12 = tpu.matmul %10, %11, %cst_10 {dimension_numbers = #tpu.dot_dimension_numbers<[1], [0], [0], [1], [0, 0, 1, 1], [], []>} : vector<3x4xf32>, vector<4x384xf32>, vector<3x384xf32> -> vector<3x384xf32>
    %13 = arith.addf %8, %12 : vector<3x384xf32>
    %c2 = arith.constant 2 : index
    %c0_11 = arith.constant 0 : index
    %c0_12 = arith.constant 0 : index
    %14 = vector.load %arg4[%c2, %c0_11, %c0_12] : memref<9x3x4xf32, #tpu.memory_space<vmem>>, vector<1x3x4xf32>
    %15 = vector.shape_cast %14 : vector<1x3x4xf32> to vector<3x4xf32>
    %16 = vector.extract_strided_slice %4 {offsets = [0, 2], sizes = [4, 384], strides = [1, 1]} : vector<4x512xf32> to vector<4x384xf32>
    %cst_13 = arith.constant dense<0.000000e+00> : vector<3x384xf32>
    %17 = tpu.matmul %15, %16, %cst_13 {dimension_numbers = #tpu.dot_dimension_numbers<[1], [0], [0], [1], [0, 0, 1, 1], [], []>} : vector<3x4xf32>, vector<4x384xf32>, vector<3x384xf32> -> vector<3x384xf32>
    %18 = arith.addf %13, %17 : vector<3x384xf32>
    %c3 = arith.constant 3 : index
    %c0_14 = arith.constant 0 : index
    %c0_15 = arith.constant 0 : index
    %19 = vector.load %arg4[%c3, %c0_14, %c0_15] : memref<9x3x4xf32, #tpu.memory_space<vmem>>, vector<1x3x4xf32>
    %20 = vector.shape_cast %19 : vector<1x3x4xf32> to vector<3x4xf32>
    %21 = vector.extract_strided_slice %4 {offsets = [0, 18], sizes = [4, 384], strides = [1, 1]} : vector<4x512xf32> to vector<4x384xf32>
    %cst_16 = arith.constant dense<0.000000e+00> : vector<3x384xf32>
    %22 = tpu.matmul %20, %21, %cst_16 {dimension_numbers = #tpu.dot_dimension_numbers<[1], [0], [0], [1], [0, 0, 1, 1], [], []>} : vector<3x4xf32>, vector<4x384xf32>, vector<3x384xf32> -> vector<3x384xf32>
    %23 = arith.addf %18, %22 : vector<3x384xf32>
    %c4 = arith.constant 4 : index
    %c0_17 = arith.constant 0 : index
    %c0_18 = arith.constant 0 : index
    %24 = vector.load %arg4[%c4, %c0_17, %c0_18] : memref<9x3x4xf32, #tpu.memory_space<vmem>>, vector<1x3x4xf32>
    %25 = vector.shape_cast %24 : vector<1x3x4xf32> to vector<3x4xf32>
    %26 = vector.extract_strided_slice %4 {offsets = [0, 19], sizes = [4, 384], strides = [1, 1]} : vector<4x512xf32> to vector<4x384xf32>
    %cst_19 = arith.constant dense<0.000000e+00> : vector<3x384xf32>
    %27 = tpu.matmul %25, %26, %cst_19 {dimension_numbers = #tpu.dot_dimension_numbers<[1], [0], [0], [1], [0, 0, 1, 1], [], []>} : vector<3x4xf32>, vector<4x384xf32>, vector<3x384xf32> -> vector<3x384xf32>
    %28 = arith.addf %23, %27 : vector<3x384xf32>
    %c5 = arith.constant 5 : index
    %c0_20 = arith.constant 0 : index
    %c0_21 = arith.constant 0 : index
    %29 = vector.load %arg4[%c5, %c0_20, %c0_21] : memref<9x3x4xf32, #tpu.memory_space<vmem>>, vector<1x3x4xf32>
    %30 = vector.shape_cast %29 : vector<1x3x4xf32> to vector<3x4xf32>
    %31 = vector.extract_strided_slice %4 {offsets = [0, 20], sizes = [4, 384], strides = [1, 1]} : vector<4x512xf32> to vector<4x384xf32>
    %cst_22 = arith.constant dense<0.000000e+00> : vector<3x384xf32>
    %32 = tpu.matmul %30, %31, %cst_22 {dimension_numbers = #tpu.dot_dimension_numbers<[1], [0], [0], [1], [0, 0, 1, 1], [], []>} : vector<3x4xf32>, vector<4x384xf32>, vector<3x384xf32> -> vector<3x384xf32>
    %33 = arith.addf %28, %32 : vector<3x384xf32>
    %c6 = arith.constant 6 : index
    %c0_23 = arith.constant 0 : index
    %c0_24 = arith.constant 0 : index
    %34 = vector.load %arg4[%c6, %c0_23, %c0_24] : memref<9x3x4xf32, #tpu.memory_space<vmem>>, vector<1x3x4xf32>
    %35 = vector.shape_cast %34 : vector<1x3x4xf32> to vector<3x4xf32>
    %36 = vector.extract_strided_slice %4 {offsets = [0, 36], sizes = [4, 384], strides = [1, 1]} : vector<4x512xf32> to vector<4x384xf32>
    %cst_25 = arith.constant dense<0.000000e+00> : vector<3x384xf32>
    %37 = tpu.matmul %35, %36, %cst_25 {dimension_numbers = #tpu.dot_dimension_numbers<[1], [0], [0], [1], [0, 0, 1, 1], [], []>} : vector<3x4xf32>, vector<4x384xf32>, vector<3x384xf32> -> vector<3x384xf32>
    %38 = arith.addf %33, %37 : vector<3x384xf32>
    %c7 = arith.constant 7 : index
    %c0_26 = arith.constant 0 : index
    %c0_27 = arith.constant 0 : index
    %39 = vector.load %arg4[%c7, %c0_26, %c0_27] : memref<9x3x4xf32, #tpu.memory_space<vmem>>, vector<1x3x4xf32>
    %40 = vector.shape_cast %39 : vector<1x3x4xf32> to vector<3x4xf32>
    %41 = vector.extract_strided_slice %4 {offsets = [0, 37], sizes = [4, 384], strides = [1, 1]} : vector<4x512xf32> to vector<4x384xf32>
    %cst_28 = arith.constant dense<0.000000e+00> : vector<3x384xf32>
    %42 = tpu.matmul %40, %41, %cst_28 {dimension_numbers = #tpu.dot_dimension_numbers<[1], [0], [0], [1], [0, 0, 1, 1], [], []>} : vector<3x4xf32>, vector<4x384xf32>, vector<3x384xf32> -> vector<3x384xf32>
    %43 = arith.addf %38, %42 : vector<3x384xf32>
    %c8 = arith.constant 8 : index
    %c0_29 = arith.constant 0 : index
    %c0_30 = arith.constant 0 : index
    %44 = vector.load %arg4[%c8, %c0_29, %c0_30] : memref<9x3x4xf32, #tpu.memory_space<vmem>>, vector<1x3x4xf32>
    %45 = vector.shape_cast %44 : vector<1x3x4xf32> to vector<3x4xf32>
    %46 = vector.extract_strided_slice %4 {offsets = [0, 38], sizes = [4, 384], strides = [1, 1]} : vector<4x512xf32> to vector<4x384xf32>
    %cst_31 = arith.constant dense<0.000000e+00> : vector<3x384xf32>
    %47 = tpu.matmul %45, %46, %cst_31 {dimension_numbers = #tpu.dot_dimension_numbers<[1], [0], [0], [1], [0, 0, 1, 1], [], []>} : vector<3x4xf32>, vector<4x384xf32>, vector<3x384xf32> -> vector<3x384xf32>
    %48 = arith.addf %43, %47 : vector<3x384xf32>
    %c0_32 = arith.constant 0 : index
    %c0_33 = arith.constant 0 : index
    %49 = vector.load %arg5[%c0_32, %c0_33] : memref<3x1xf32, #tpu.memory_space<vmem>>, vector<3x1xf32>
    %50 = vector.broadcast %49 : vector<3x1xf32> to vector<3x384xf32>
    %51 = arith.addf %48, %50 : vector<3x384xf32>
    %c0_34 = arith.constant 0 : index
    %c0_35 = arith.constant 0 : index
    %c0_36 = arith.constant 0 : index
    %52 = vector.load %arg6[%c0_34, %c0_35, %c0_36] : memref<1x3x384xf32, #tpu.memory_space<vmem>>, vector<1x3x384xf32>
    %53 = vector.shape_cast %52 : vector<1x3x384xf32> to vector<3x384xf32>
    %54 = vector.shape_cast %51 : vector<3x384xf32> to vector<1x3x384xf32>
    tpu.vector_store %arg6[%c0_34, %c0_35, %c0_36], %54 {strides = array<i32>} : memref<1x3x384xf32, #tpu.memory_space<vmem>>, vector<1x3x384xf32>,
    return
  }
  func.func @transform_0(%arg0: i32, %arg1: i32) -> (i32, i32, i32) {
    %c0_i32 = arith.constant 0 : i32
    %c0_i32_0 = arith.constant 0 : i32
    return %arg0, %c0_i32, %arg1 : i32, i32, i32
  }
  func.func @transform_1(%arg0: i32, %arg1: i32) -> (i32, i32, i32) {
    %c1_i32 = arith.constant 1 : i32
    %0 = arith.addi %arg1, %c1_i32 : i32
    %c3_i32 = arith.constant 3 : i32
    %1 = arith.muli %0, %c3_i32 : i32
    %c0_i32 = arith.constant 0 : i32
    %c0_i32_0 = arith.constant 0 : i32
    return %arg0, %c0_i32, %1 : i32, i32, i32
  }
  func.func @transform_2(%arg0: i32, %arg1: i32) -> (i32, i32, i32) {
    %c0_i32 = arith.constant 0 : i32
    %c0_i32_0 = arith.constant 0 : i32
    %c0_i32_1 = arith.constant 0 : i32
    %c0_i32_2 = arith.constant 0 : i32
    return %c0_i32, %c0_i32_0, %c0_i32_1 : i32, i32, i32
  }
  func.func @transform_3(%arg0: i32, %arg1: i32) -> (i32, i32) {
    %c0_i32 = arith.constant 0 : i32
    %c0_i32_0 = arith.constant 0 : i32
    %c0_i32_1 = arith.constant 0 : i32
    return %c0_i32, %c0_i32_0 : i32, i32
  }
  func.func @transform_4(%arg0: i32, %arg1: i32) -> (i32, i32, i32) {
    %c0_i32 = arith.constant 0 : i32
    %c0_i32_0 = arith.constant 0 : i32
    return %arg0, %c0_i32, %arg1 : i32, i32, i32
  }
}

</mosaic_0001>

<bundles_post_ra>
// kernel: _head_forward.1
= control target key start
LH: loop header
LB: loop body
LE: loop exit
PB: predicated region body
PF: predicated region fallthrough
CT: control target
= control target key end

     0   :  { %s2140_s15 = smov 0   ;;  %s2142_s16 = smov 0   ;;  %s2350_s0 = inlined_call_operand.vmem [shape: f32[2,4,768], index: 0, kind: input, shape index: {}, may-alias: {0,1}]   ;;  %s2351_s1 = inlined_call_operand.vmem [shape: f32[2,4,768], index: 1, kind: input, shape index: {}, may-alias: {0,1}]   ;;  %s2352_s2 = inlined_call_operand.vmem [shape: f32[9,3,4], index: 2, kind: input, shape index: {}]   ;;  %s2353_s3 = inlined_call_operand.vmem [shape: f32[3,1], index: 3, kind: input, shape index: {}]   ;;  %s2354_s4 = inlined_call_operand.vmem [shape: f32[2,3,384], index: 4, kind: output, shape index: {}]  }
   0x1   :  { %s2144_s17 = smov 0  }
   0x2 LB: > { %s26_s18 = sadd.s32 1, %s2098_s16  ;;  %p1899_p0 = scmp.ge.s32.totalorder %s2102_s17, 1  ;;  %s2102_s17 = sphi %s2144_s17, %s14_s17   ;;  %s2098_s16 = sphi %s2142_s16, %s2356_s16   ;;  %s2094_s15 = sphi %s2140_s15, %s2355_s15  }
   0x3   : > { %p28_p1 = scmp.ge.s32.totalorder %s26_s18, 2  ;;  %p206_p2 = scmp.lt.s32.totalorder %s2102_s17, 3 }
   0x5   : > { %s2358_s18 = smov (%p28_p1, %s26_s18), 0  ;;  %p207_p3 = pnand %p1899_p0, %p206_p2 }
   0x6   : > { %p251_p4 = scmp.lt.s32.totalorder (!%p207_p3), %s2094_s15, 1  ;;  %v2104_v0 = vmov (!%p207_p3), 0.0   ;;  %s2105_s23 = smov (!%p207_p3), 127   ;;  %vm2109_vm0 = vmmov (!%p207_p3), 0   ;;  %v2114_v5 = vmov (!%p207_p3), 0   ;;  %vm300_vm1 = vcmask (!%p207_p3), 1039360  }
   0x7   : > { %210 = sbr.rel (%p207_p3) target bundleno = 425 (0x1a9), region = 36  ;;  %379 = vmatprep.mubr.f32.mxu0 (!%p207_p3), %v2104_v0  ;;  %1978 = vmatprep.subr.mxu1 (!%p207_p3), %v2104_v0  ;;  %s2106_s24 = smov (!%p207_p3), 126   ;;  %v1775_v6 = vld [vmem:[%s2353_s3] sm:$0x7] (!%p207_p3)  ;;  %vm308_vm2 = vcmask (!%p207_p3), 1043456   ;;  %vm304_vm3 = vcmask (!%p207_p3), 31744  }
   0x8   : > { %s2107_s25 = smov (!%p207_p3), 110   ;;  %s2108_s26 = smov (!%p207_p3), 109   ;;  %1980 = vmatprep.mubr.msk.f32.mxu1 (!%p207_p3), %vm2109_vm0, %v2104_v0  ;;  %2078 = vset.pattern.permute.xlu0 (!%p207_p3), %v2114_v5  ;;  %v1903_v12 = vld [vmem:[%s2352_s2 + $0x4] sm:$0x7] (!%p207_p3)  ;;  %vm616_vm4 = vcmask (!%p207_p3), 1031168   ;;  %vm783_vm5 = vcmask (!%p207_p3), 900096  }
   0x9   : > { %s2110_s5 = smov (!%p207_p3), 108   ;;  %s2111_s6 = smov (!%p207_p3), 92   ;;  %v288_v19 = vld [vmem:[%s2352_s2] sm:$0x7] (!%p207_p3)  ;;  %vm950_vm6 = vcmask (!%p207_p3), 891904   ;;  %vm1117_vm7 = vcmask (!%p207_p3), 883712  }
   0xa   : > { %s2112_s7 = smov (!%p207_p3), 91   ;;  %s2113_s8 = smov (!%p207_p3), 90   ;;  %v1914_v26 = vld [vmem:[%s2352_s2 + $0x8] sm:$0x7] (!%p207_p3)  ;;  %v1920_v34 = vld [vmem:[%s2352_s2 + $0xc] sm:$0x7] (!%p207_p3) }
   0xb   : > { %vm1284_vm8 = vcmask (!%p207_p3), 752640   ;;  %v1926_v43 = vld [vmem:[%s2352_s2 + $0x10] sm:$0x7] (!%p207_p3)  ;;  %v1932_v51 = vld [vmem:[%s2352_s2 + $0x14] sm:$0x7] (!%p207_p3)  ;;  %vm1451_vm9 = vcmask (!%p207_p3), 744448  }
   0xc   : > { %v1938_v59 = vld [vmem:[%s2352_s2 + $0x18] sm:$0x7] (!%p207_p3)  ;;  %vm1618_vm10 = vcmask (!%p207_p3), 736256  }
   0xe   : > { %s2360_s15 = smov (!%p251_p4, %s2094_s15), 1 }
   0xf   : > { %s2039_s19 = smul.u32 24, %s2360_s15 }
  0x11   : > { %s258_s22 = scalar_lea.vmem %s2350_s0, %s2039_s19  ;;  %s1959_s27 = sadd.s32 12, %s2039_s19 }
  0x12   : > { %v2166_v1 = vld [vmem:[%s258_s22] sm:$0xff]  ;;  %v2174_v3 = vld [vmem:[%s258_s22 + $0x8] sm:$0xf]  ;;  %s269_s30 = scalar_lea.vmem %s2351_s1, %s1959_s27 }
  0x13   : > { %292 = vrot.lane.b32.xlu1 %v2166_v1, %s2105_s23  ;;  %v2171_v2 = vcombine.high %v2166_v1, %v2166_v1  ;;  %v284_v4 = vld [vmem:[%s269_s30] sm:$0xf] }
  0x15   : > { %294 = vrot.lane.b32.xlu0 %v2171_v2, %s2105_s23 }
  0x17   : > { %608 = vrot.lane.b32.xlu1 %v2166_v1, %s2106_s24 }
  0x19   : > { %296 = vrot.lane.b32.xlu0 %v2174_v3, %s2105_s23 }
  0x1b   : > { %610 = vrot.lane.b32.xlu1 %v2171_v2, %s2106_s24 }
  0x1d   : > { %612 = vrot.lane.b32.xlu0 %v2174_v3, %s2106_s24 }
  0x1f   : > { %779 = vrot.lane.b32.xlu1 %v2174_v3, %s2107_s25 }
  0x21   : > { %777 = vrot.lane.b32.xlu0 %v2171_v2, %s2107_s25 }
  0x23   : > { %944 = vrot.lane.b32.xlu1 %v2171_v2, %s2108_s26 }
  0x25   : > { %775 = vrot.lane.b32.xlu0 %v2166_v1, %s2107_s25 }
  0x27   : > { %942 = vrot.lane.b32.xlu1 %v2166_v1, %s2108_s26 }
  0x29   : > { %946 = vrot.lane.b32.xlu0 %v2174_v3, %s2108_s26 }
  0x2b   : > { %1111 = vrot.lane.b32.xlu1 %v2171_v2, %s2110_s5 }
  0x2d   : > { %298 = vrot.lane.b32.xlu0 %v284_v4, %s2105_s23 }
  0x2f   : > { %1109 = vrot.lane.b32.xlu1 %v2166_v1, %s2110_s5 }
  0x31   : > { %1113 = vrot.lane.b32.xlu0 %v2174_v3, %s2110_s5 }
  0x33   : > { %781 = vrot.lane.b32.xlu1 %v284_v4, %s2107_s25 }
  0x35   : > { %614 = vrot.lane.b32.xlu0 %v284_v4, %s2106_s24 }
  0x37   : > { %1280 = vrot.lane.b32.xlu1 %v2174_v3, %s2111_s6 }
  0x39   : > { %1278 = vrot.lane.b32.xlu0 %v2171_v2, %s2111_s6 }
  0x3b   : > { %948 = vrot.lane.b32.xlu1 %v284_v4, %s2108_s26 }
  0x3d   : > { %1276 = vrot.lane.b32.xlu0 %v2166_v1, %s2111_s6 }
  0x3f   : > { %1445 = vrot.lane.b32.xlu1 %v2171_v2, %s2112_s7 }
  0x41   : > { %1115 = vrot.lane.b32.xlu0 %v284_v4, %s2110_s5 }
  0x43   : > { %1443 = vrot.lane.b32.xlu1 %v2166_v1, %s2112_s7 }
  0x45   : > { %1447 = vrot.lane.b32.xlu0 %v2174_v3, %s2112_s7 }
  0x47   : > { %1449 = vrot.lane.b32.xlu1 %v284_v4, %s2112_s7  ;;  %s2041_s7 = smul.u32 12, %s2360_s15 }
  0x49   : > { %1282 = vrot.lane.b32.xlu0 %v284_v4, %s2111_s6  ;;  %s280_s10 = scalar_lea.vmem %s2354_s4, %s2041_s7 }
  0x4b   : > { %1614 = vrot.lane.b32.xlu1 %v2174_v3, %s2113_s8 }
  0x4d   : > { %1612 = vrot.lane.b32.xlu0 %v2171_v2, %s2113_s8 }
  0x4f   : > { %1616 = vrot.lane.b32.xlu1 %v284_v4, %s2113_s8 }
  0x51   : > { %1610 = vrot.lane.b32.xlu0 %v2166_v1, %s2113_s8 }
  0x55   : > { %1778 = vperm.xlu0 %2078, %v1775_v6  }
  0x85   : > { %v293_v7 = vpop.permute.xlu1 %292 }
  0x87   : > { %v295_v8 = vpop.permute.xlu0 %294 }
  0x88   : > { %v301_v14 = vsel %vm300_vm1, %v293_v7, %v295_v8  ;;  %v1950_v7 = vld [vmem:[%s2352_s2 + $0x20] sm:$0x7] }
  0x89   : > { %v609_v9 = vpop.permute.xlu1 %608 }
  0x8b   : > { %v297_v10 = vpop.permute.xlu0 %296 }
  0x8c   : > { %v302_v11 = vsel %vm300_vm1, %v295_v8, %v297_v10 }
  0x8d   : > { %v611_v13 = vpop.permute.xlu1 %610  ;;  %1904 = vmatprep.subr.msk.mxu0 %vm308_vm2, %v302_v11 }
  0x8e   : > { %1905 = vmatpush1.msk.msra.mxu0 %vm308_vm2, %v301_v14  ;;  %v617_v20 = vsel %vm616_vm4, %v609_v9, %v611_v13 }
  0x8f   : > { %1906 = vmatmul.mubr.msk.f32.vlgmr.msra.gmra.mrb[0].mxu0 %vm304_vm3, %v1903_v12  ;;  %1909 = vmatprep.subr.msk.mxu0 %vm308_vm2, %v2171_v2  ;;  %v613_v15 = vpop.permute.xlu0 %612  ;;  %v1944_v2 = vld [vmem:[%s2352_s2 + $0x1c] sm:$0x7] }
  0x90   : > { %v618_v16 = vsel %vm616_vm4, %v611_v13, %v613_v15  ;;  %1910 = vmatpush1.msk.msra.mxu0 %vm308_vm2, %v2166_v1  ;;  %529 = vmatprep.mubr.f32.mxu0 %v2104_v0 }
  0x91   : > { %v780_v17 = vpop.permute.xlu1 %779  ;;  %1915 = vmatprep.subr.msk.mxu0 %vm308_vm2, %v618_v16 }
  0x93   : > { %v778_v18 = vpop.permute.xlu0 %777 }
  0x94   : > { %v785_v22 = vsel %vm783_vm5, %v778_v18, %v780_v17 }
  0x95   : > { %v945_v21 = vpop.permute.xlu1 %944 }
  0x97   : > { %1911 = vmatmul.mubr.msk.f32.vlgmr.msra.gmra.mrb[0].mxu0 %vm304_vm3, %v288_v19  ;;  %v776_v23 = vpop.permute.xlu0 %775 }
  0x98   : > { %1916 = vmatpush1.msk.msra.mxu0 %vm308_vm2, %v617_v20  ;;  %693 = vmatprep.mubr.f32.mxu0 %v2104_v0  ;;  %v784_v27 = vsel %vm783_vm5, %v776_v23, %v778_v18 }
  0x99   : > { %1921 = vmatprep.subr.msk.mxu0 %vm308_vm2, %v785_v22  ;;  %v943_v24 = vpop.permute.xlu1 %942 }
  0x9a   : > { %v951_v37 = vsel %vm950_vm6, %v943_v24, %v945_v21 }
  0x9b   : > { %v947_v25 = vpop.permute.xlu0 %946 }
  0x9c   : > { %v952_v29 = vsel %vm950_vm6, %v945_v21, %v947_v25 }
  0x9d   : > { %v1112_v28 = vpop.permute.xlu1 %1111 }
  0x9f   : > { %1917 = vmatmul.mubr.msk.f32.vlgmr.msra.gmra.mrb[0].mxu0 %vm304_vm3, %v1914_v26  ;;  %v299_v30 = vpop.permute.xlu0 %298 }
  0xa0   : > { %1922 = vmatpush1.msk.msra.mxu0 %vm308_vm2, %v784_v27  ;;  %v303_v31 = vsel %vm300_vm1, %v297_v10, %v299_v30  ;;  %860 = vmatprep.mubr.f32.mxu0 %v2104_v0 }
  0xa1   : > { %1927 = vmatprep.subr.msk.mxu0 %vm308_vm2, %v952_v29  ;;  %v1110_v32 = vpop.permute.xlu1 %1109  ;;  %1979 = vmatpush3.msk.msra.mxu1 %vm308_vm2, %v303_v31 }
  0xa2   : > { %1981 = vmatmul.mubr.msk.f32.vlgmr.msra.gmra.mrb[0].mxu1 %vm304_vm3, %v1903_v12  ;;  %1983 = vmatprep.subr.mxu1 %v2104_v0  ;;  %v1118_v47 = vsel %vm1117_vm7, %v1110_v32, %v1112_v28 }
  0xa3   : > { %v1114_v33 = vpop.permute.xlu0 %1113  ;;  %1984 = vmatpush3.msk.msra.mxu1 %vm308_vm2, %v2174_v3  ;;  %1985 = vmatprep.mubr.msk.f32.mxu1 %vm2109_vm0, %v2104_v0 }
  0xa4   : > { %1988 = vmatprep.subr.mxu1 %v2104_v0  ;;  %v1119_v36 = vsel %vm1117_vm7, %v1112_v28, %v1114_v33 }
  0xa5   : > { %v782_v35 = vpop.permute.xlu1 %781 }
  0xa6   : > { %1986 = vmatmul.mubr.msk.f32.vlgmr.msra.gmra.mrb[2].mxu1 %vm304_vm3, %v288_v19  ;;  %v786_v41 = vsel %vm783_vm5, %v780_v17, %v782_v35 }
  0xa7   : > { %1923 = vmatmul.mubr.msk.f32.vlgmr.msra.gmra.mrb[0].mxu0 %vm304_vm3, %v1920_v34  ;;  %v615_v38 = vpop.permute.xlu0 %614  ;;  %1990 = vmatprep.mubr.msk.f32.mxu1 %vm2109_vm0, %v2104_v0 }
  0xa8   : > { %1928 = vmatpush1.msk.msra.mxu0 %vm308_vm2, %v951_v37  ;;  %v619_v39 = vsel %vm616_vm4, %v613_v15, %v615_v38  ;;  %1027 = vmatprep.mubr.f32.mxu0 %v2104_v0 }
  0xa9   : > { %1933 = vmatprep.subr.msk.mxu0 %vm308_vm2, %v1119_v36  ;;  %v1281_v40 = vpop.permute.xlu1 %1280  ;;  %1989 = vmatpush3.msk.msra.mxu1 %vm308_vm2, %v619_v39 }
  0xaa   : > { %1993 = vmatprep.subr.mxu1 %v2104_v0  ;;  %1991 = vmatmul.mubr.msk.f32.vlgmr.msra.gmra.mrb[4].mxu1 %vm304_vm3, %v1914_v26 }
  0xab   : > { %1994 = vmatpush3.msk.msra.mxu1 %vm308_vm2, %v786_v41  ;;  %v1279_v42 = vpop.permute.xlu0 %1278  ;;  %1995 = vmatprep.mubr.msk.f32.mxu1 %vm2109_vm0, %v2104_v0 }
  0xac   : > { %1998 = vmatprep.subr.mxu1 %v2104_v0  ;;  %v1286_v45 = vsel %vm1284_vm8, %v1279_v42, %v1281_v40 }
  0xad   : > { %v949_v44 = vpop.permute.xlu1 %948 }
  0xae   : > { %v953_v46 = vsel %vm950_vm6, %v947_v25, %v949_v44  ;;  %1996 = vmatmul.mubr.msk.f32.vlgmr.msra.gmra.mrb[6].mxu1 %vm304_vm3, %v1920_v34 }
  0xaf   : > { %1929 = vmatmul.mubr.msk.f32.vlgmr.msra.gmra.mrb[0].mxu0 %vm304_vm3, %v1926_v43  ;;  %1999 = vmatpush3.msk.msra.mxu1 %vm308_vm2, %v953_v46  ;;  %v1277_v48 = vpop.permute.xlu0 %1276 }
  0xb0   : > { %1934 = vmatpush1.msk.msra.mxu0 %vm308_vm2, %v1118_v47  ;;  %2000 = vmatprep.mubr.msk.f32.mxu1 %vm2109_vm0, %v2104_v0  ;;  %v1285_v53 = vsel %vm1284_vm8, %v1277_v48, %v1279_v42 }
  0xb1   : > { %1939 = vmatprep.subr.msk.mxu0 %vm308_vm2, %v1286_v45  ;;  %v1446_v49 = vpop.permute.xlu1 %1445  ;;  %2003 = vmatprep.subr.mxu1 %v2104_v0 }
  0xb2   : > { %2001 = vmatmul.mubr.msk.f32.vlgmr.msra.gmra.mrb[8].mxu1 %vm304_vm3, %v1926_v43  ;;  %1194 = vmatprep.mubr.f32.mxu0 %v2104_v0 }
  0xb3   : > { %v1116_v50 = vpop.permute.xlu0 %1115  ;;  %2005 = vmatprep.mubr.msk.f32.mxu1 %vm2109_vm0, %v2104_v0 }
  0xb4   : > { %v1120_v52 = vsel %vm1117_vm7, %v1114_v33, %v1116_v50 }
  0xb5   : > { %2004 = vmatpush3.msk.msra.mxu1 %vm308_vm2, %v1120_v52  ;;  %v1444_v54 = vpop.permute.xlu1 %1443 }
  0xb6   : > { %2006 = vmatmul.mubr.msk.f32.vlgmr.msra.gmra.mrb[10].mxu1 %vm304_vm3, %v1932_v51  ;;  %2008 = vmatprep.subr.mxu1 %v2104_v0  ;;  %v1452_v62 = vsel %vm1451_vm9, %v1444_v54, %v1446_v49 }
  0xb7   : > { %1935 = vmatmul.mubr.msk.f32.vlgmr.msra.gmra.mrb[0].mxu0 %vm304_vm3, %v1932_v51  ;;  %v1448_v55 = vpop.permute.xlu0 %1447  ;;  %2010 = vmatprep.mubr.msk.f32.mxu1 %vm2109_vm0, %v2104_v0 }
  0xb8   : > { %1940 = vmatpush1.msk.msra.mxu0 %vm308_vm2, %v1285_v53  ;;  %v1453_v56 = vsel %vm1451_vm9, %v1446_v49, %v1448_v55  ;;  %1361 = vmatprep.mubr.f32.mxu0 %v2104_v0 }
  0xb9   : > { %v1450_v57 = vpop.permute.xlu1 %1449  ;;  %1945 = vmatprep.subr.msk.mxu0 %vm308_vm2, %v1453_v56 }
  0xba   : > { %v1454_v60 = vsel %vm1451_vm9, %v1448_v55, %v1450_v57 }
  0xbb   : > { %v1283_v58 = vpop.permute.xlu0 %1282 }
  0xbc   : > { %v1287_v61 = vsel %vm1284_vm8, %v1281_v40, %v1283_v58 }
  0xbd   : > { %2009 = vmatpush3.msk.msra.mxu1 %vm308_vm2, %v1287_v61  ;;  %v1615_v63 = vpop.permute.xlu1 %1614 }
  0xbe   : > { %2011 = vmatmul.mubr.msk.f32.vlgmr.msra.gmra.mrb[12].mxu1 %vm304_vm3, %v1938_v59  ;;  %2013 = vmatprep.subr.mxu1 %v2104_v0 }
  0xbf   : > { %1941 = vmatmul.mubr.msk.f32.vlgmr.msra.gmra.mrb[0].mxu0 %vm304_vm3, %v1938_v59  ;;  %2014 = vmatpush3.msk.msra.mxu1 %vm308_vm2, %v1454_v60  ;;  %v1613_v1 = vpop.permute.xlu0 %1612 }
  0xc0   : > { %1946 = vmatpush1.msk.msra.mxu0 %vm308_vm2, %v1452_v62  ;;  %v1620_v3 = vsel %vm1618_vm10, %v1613_v1, %v1615_v63  ;;  %2015 = vmatprep.mubr.msk.f32.mxu1 %vm2109_vm0, %v2104_v0 }
  0xc1   : > { %v1617_v4 = vpop.permute.xlu1 %1616  ;;  %1951 = vmatprep.subr.msk.mxu0 %vm308_vm2, %v1620_v3  ;;  %2018 = vmatprep.subr.mxu1 %v2104_v0 }
  0xc2   : > { %2016 = vmatmul.mubr.msk.f32.vlgmr.msra.gmra.mrb[14].mxu1 %vm304_vm3, %v1944_v2  ;;  %v1621_v5 = vsel %vm1618_vm10, %v1615_v63, %v1617_v4  ;;  %1528 = vmatprep.mubr.f32.mxu0 %v2104_v0 }
  0xc3   : > { %v1611_v6 = vpop.permute.xlu0 %1610  ;;  %2019 = vmatpush3.msk.msra.mxu1 %vm308_vm2, %v1621_v5  ;;  %2020 = vmatprep.mubr.msk.f32.mxu1 %vm2109_vm0, %v2104_v0 }
  0xc4   : > { %v1619_v8 = vsel %vm1618_vm10, %v1611_v6, %v1613_v1 }
  0xc6   : > { %2021 = vmatmul.mubr.msk.f32.vlgmr.msra.gmra.mrb[16].mxu1 %vm304_vm3, %v1950_v7 }
  0xc7   : > { %1947 = vmatmul.mubr.msk.f32.vlgmr.msra.gmra.mrb[0].mxu0 %vm304_vm3, %v1944_v2 }
  0xc8   : > { %1952 = vmatpush1.msk.msra.mxu0 %vm308_vm2, %v1619_v8  ;;  %1695 = vmatprep.mubr.f32.mxu0 %v2104_v0 }
  0xcf   : > { %1953 = vmatmul.mubr.msk.f32.vlgmr.msra.gmra.mrb[0].mxu0 %vm304_vm3, %v1950_v7 }
  0xd4   : > { %v1779_v32 = vpop.permute.xlu0 %1778 }
 0x175   : > { %v452_v9 = vpop.f32.mrb[0].mxu1 }
 0x176   : > { %v1982_v10 = vpop.f32.mrb[1].mxu1 }
 0x179   : > { %v602_v11 = vpop.f32.mrb[2].mxu1 }
 0x17a   : > { %v603_v12 = vadd.f32 %v602_v11, %v452_v9  ;;  %v1987_v13 = vpop.f32.mrb[3].mxu1 }
 0x17d   : > { %v766_v14 = vpop.f32.mrb[4].mxu1 }
 0x17e   : > { %v772_v15 = vadd.f32 %v766_v14, %v603_v12  ;;  %v1992_v16 = vpop.f32.mrb[5].mxu1 }
 0x181   : > { %v933_v17 = vpop.f32.mrb[6].mxu1 }
 0x182   : > { %v939_v18 = vadd.f32 %v933_v17, %v772_v15  ;;  %v1997_v19 = vpop.f32.mrb[7].mxu1 }
 0x185   : > { %v1100_v20 = vpop.f32.mrb[8].mxu1 }
 0x186   : > { %v1106_v21 = vadd.f32 %v1100_v20, %v939_v18  ;;  %v2002_v22 = vpop.f32.mrb[9].mxu1 }
 0x189   : > { %v1267_v23 = vpop.f32.mrb[10].mxu1 }
 0x18a   : > { %v1273_v24 = vadd.f32 %v1267_v23, %v1106_v21  ;;  %v2007_v0 = vpop.f32.mrb[11].mxu1 }
 0x191   : > { %v1434_v25 = vpop.f32.mrb[12].mxu1 }
 0x192   : > { %v1440_v26 = vadd.f32 %v1434_v25, %v1273_v24  ;;  %v2012_v27 = vpop.f32.mrb[13].mxu1 }
 0x195   : > { %v1601_v28 = vpop.f32.mrb[14].mxu1 }
 0x196   : > { %v1607_v29 = vadd.f32 %v1601_v28, %v1440_v26  ;;  %v2017_v30 = vpop.f32.mrb[15].mxu1 }
 0x199   : > { %v1768_v31 = vpop.f32.mrb[16].mxu1 }
 0x19a   : > { %v1774_v33 = vadd.f32 %v1768_v31, %v1607_v29  ;;  %v2022_v34 = vpop.f32.mrb[17].mxu1 }
 0x19c   : > { %v1783_v35 = vadd.f32 %v1779_v32, %v1774_v33 }
 0x19e   : > { %1789 = vst [vmem:[%s280_s10 + $0x8] sm:$0x7] %v1783_v35 }
 0x1a2   : > { %v1697_v36 = vpop.f32.mrb[0].mxu0 }
 0x1a3   : > { %v1781_v37 = vadd.f32 %v1779_v32, %v1697_v36  ;;  %v1699_v38 = vpop.f32.mrb[1].mxu0 }
 0x1a4   : > { %v1782_v39 = vadd.f32 %v1779_v32, %v1699_v38 }
 0x1a6   : > { %v1786_v40 = vcombine.low %v1781_v37, %v1782_v39 }
 0x1a8   : > { %1788 = vst [vmem:[%s280_s10] sm:$0x77] %v1786_v40 }
 0x1a9 PF: > { %s14_s17 = sadd.s32 1, %s2102_s17   ;;  %s2355_s15 = smov %s2098_s16 }
 0x1aa   : > { %p11_p5 = scmp.ge.s32.totalorder %s14_s17, 4   ;;  %s2356_s16 = smov %s2358_s18 }
 0x1ac   :  { %13 = sbr.rel (!%p11_p5) target bundleno = 2 (0x2), region = 77 }

</bundles_post_ra>
